<compile_context>
chip_gen: v7x
topology: tpu7x:2x2x1
jax: 0.10.0
libtpu: 0.0.40
codegen_flags: <defaults>
</compile_context>

<pallas_src>
import functools

import jax
import jax.numpy as jnp
from jax import lax
from jax.experimental import pallas as pl
from jax.experimental.pallas import tpu as pltpu


def _round_up(x, m):
    return (x + m - 1) // m * m


# ----------------------------- Pallas kernels -----------------------------

def _mm_bias_act_kernel(a_ref, b_ref, bias_ref, o_ref, acc_ref, *, apply_relu):
    """K-tiled matmul with f32 VMEM accumulator; bias (+ optional ReLU) epilogue."""
    k = pl.program_id(2)

    @pl.when(k == 0)
    def _():
        acc_ref[...] = jnp.zeros_like(acc_ref)

    acc_ref[...] += jnp.dot(a_ref[...], b_ref[...],
                            preferred_element_type=jnp.float32)

    @pl.when(k == pl.num_programs(2) - 1)
    def _():
        y = acc_ref[...] + bias_ref[...]
        if apply_relu:
            y = jnp.maximum(y, 0.0)
        o_ref[...] = y.astype(o_ref.dtype)


def _mm_bias_act_single_k_kernel(a_ref, b_ref, bias_ref, o_ref, *, apply_relu):
    """Single-K-step matmul: skip the scratch accumulator round-trip entirely."""
    y = jnp.dot(a_ref[...], b_ref[...], preferred_element_type=jnp.float32)
    y = y + bias_ref[...]
    if apply_relu:
        y = jnp.maximum(y, 0.0)
    o_ref[...] = y.astype(o_ref.dtype)


def pallas_matmul_bias_act(a, b, bias, apply_relu=False,
                           tm_max=512, tn_max=256, tk_max=2048):
    """a: (M, K), b: (K, N) (ideally pre-padded/bf16), bias: (1, N) f32.
    Returns f32 (M, N) = (a @ b) + bias, optionally ReLU'd. bf16 MXU inputs,
    f32 accumulation."""
    M, K = a.shape
    K2, N = b.shape
    assert K == K2 and bias.shape == (1, N)

    tm = min(tm_max, _round_up(M, 16))
    tn = min(tn_max, _round_up(N, 128))
    tk = min(tk_max, _round_up(K, 128))
    Mp, Np, Kp = _round_up(M, tm), _round_up(N, tn), _round_up(K, tk)

    a = a.astype(jnp.bfloat16)
    b = b.astype(jnp.bfloat16)
    bias = bias.astype(jnp.float32)
    if (Mp, Kp) != (M, K):
        a = jnp.pad(a, ((0, Mp - M), (0, Kp - K)))
    if (Kp, Np) != (K, N):
        b = jnp.pad(b, ((0, Kp - K), (0, Np - N)))
    if Np != N:
        bias = jnp.pad(bias, ((0, 0), (0, Np - N)))

    k_steps = Kp // tk
    if k_steps == 1:
        kernel = functools.partial(_mm_bias_act_single_k_kernel,
                                   apply_relu=apply_relu)
        out = pl.pallas_call(
            kernel,
            out_shape=jax.ShapeDtypeStruct((Mp, Np), jnp.float32),
            grid=(Mp // tm, Np // tn),
            in_specs=[pl.BlockSpec((tm, tk), lambda i, j: (i, 0)),
                      pl.BlockSpec((tk, tn), lambda i, j: (0, j)),
                      pl.BlockSpec((1, tn), lambda i, j: (0, j))],
            out_specs=pl.BlockSpec((tm, tn), lambda i, j: (i, j)),
            compiler_params=pltpu.CompilerParams(
                dimension_semantics=("parallel", "parallel"),
                vmem_limit_bytes=32 * 1024 * 1024),
        )(a, b, bias)
    else:
        kernel = functools.partial(_mm_bias_act_kernel, apply_relu=apply_relu)
        out = pl.pallas_call(
            kernel,
            out_shape=jax.ShapeDtypeStruct((Mp, Np), jnp.float32),
            grid=(Mp // tm, Np // tn, k_steps),
            in_specs=[pl.BlockSpec((tm, tk), lambda i, j, k: (i, k)),
                      pl.BlockSpec((tk, tn), lambda i, j, k: (k, j)),
                      pl.BlockSpec((1, tn), lambda i, j, k: (0, j))],
            out_specs=pl.BlockSpec((tm, tn), lambda i, j, k: (i, j)),
            scratch_shapes=[pltpu.VMEM((tm, tn), jnp.float32)],
            compiler_params=pltpu.CompilerParams(
                dimension_semantics=("parallel", "parallel", "arbitrary"),
                vmem_limit_bytes=32 * 1024 * 1024),
        )(a, b, bias)
    if (Mp, Np) != (M, N):
        out = out[:M, :N]
    return out


def _add_relu_kernel(x_ref, r_ref, o_ref):
    o_ref[...] = jnp.maximum(x_ref[...] + r_ref[...], 0.0)


def pallas_residual_relu(x, r):
    """x: (N, S, C) f32; r: (N, Sr, C) f32 with Sr in {1, S}.
    Returns relu(x + r) (r broadcasts over the S axis when Sr == 1)."""
    n, s, c = x.shape
    _, sr, _ = r.shape
    return pl.pallas_call(
        _add_relu_kernel,
        out_shape=jax.ShapeDtypeStruct((n, s, c), jnp.float32),
        grid=(n,),
        in_specs=[pl.BlockSpec((1, s, c), lambda i: (i, 0, 0)),
                  pl.BlockSpec((1, sr, c), lambda i: (i, 0, 0))],
        out_specs=pl.BlockSpec((1, s, c), lambda i: (i, 0, 0)),
        compiler_params=pltpu.CompilerParams(
            dimension_semantics=("parallel",)),
    )(x.astype(jnp.float32), r.astype(jnp.float32))


# ----------------------------- conv lowering (glue) -----------------------------

def _im2col(x, kt, dt, kh, kw, pad_t_left, pad_hw, stride_hw):
    """x: (N, T, H, W, C) channels-last.  Left-only temporal padding, i.e.
    exactly Conv3d(pad=(pad_t,1,1), dilation=(dt,1,1), stride=(1,s,s)) restricted
    to the first T output frames (the frames Chomp3d keeps)."""
    n, t, h, w, c = x.shape
    xp = jnp.pad(x, ((0, 0), (pad_t_left, 0),
                     (pad_hw, pad_hw), (pad_hw, pad_hw), (0, 0)))
    t_out = t
    h_out = (h + 2 * pad_hw - kh) // stride_hw + 1
    w_out = (w + 2 * pad_hw - kw) // stride_hw + 1
    cols = []
    for jt in range(kt):
        for jh in range(kh):
            for jw in range(kw):
                sl = xp[:, jt * dt: jt * dt + t_out,
                        jh: jh + stride_hw * (h_out - 1) + 1: stride_hw,
                        jw: jw + stride_hw * (w_out - 1) + 1: stride_hw, :]
                cols.append(sl)
    patches = jnp.stack(cols, axis=-2)        # (N,T,Ho,Wo, kt*kh*kw, C)
    patches = patches.reshape(n * t_out * h_out * w_out, kt * kh * kw * c)
    return patches, (t_out, h_out, w_out)


# ----------------------------- TemporalBlockOriginal.forward -----------------------------

def temporal_block_forward(data, blk):
    """data: (N, C, T, H, W) f32 (PyTorch NCDHW).  Mirrors the given forward()."""
    n, c, t, h, w = data.shape
    tp, d, k, cout = blk["tp"], blk["dilation"], blk["k"], blk["cout"]
    assert c == blk["w"].shape[1], "conv2 expects n_outputs input channels"

    # chomp1 -> relu1 -> dropout1(identity)
    y = jnp.maximum(data[:, :, : t - tp], 0.0)                  # (N, C, T-tp, H, W)

    # conv2 + chomp2 fused (only kept frames computed) -> relu2 (fused) -> dropout2(identity)
    y = jnp.transpose(y, (0, 2, 3, 4, 1))                       # (N, Tc, H, W, C)
    patches, (t_o, h_o, w_o) = _im2col(y, k, d, k, k, tp, 1, 2)
    flat = pallas_matmul_bias_act(patches, blk["w_mat"], blk["b_pad"],
                                  apply_relu=True)              # (M, Cpad) f32
    conv_out = flat[:, :cout].reshape(n, t_o * h_o * w_o, cout)

    # residual branch
    res = jnp.transpose(data, (0, 2, 3, 4, 1)).reshape(n, t * h * w, c)
    if "w_ds_mat" in blk:   # 1x1x1 downsample conv (unreachable with the given forward())
        ds = pallas_matmul_bias_act(res.reshape(n * t * h * w, c),
                                    blk["w_ds_mat"], blk["b_ds_pad"])
        res = ds[:, :cout].reshape(n, t * h * w, cout)

    s_out = t_o * h_o * w_o
    assert s_out == 1 or (t_o, h_o, w_o) == (t, h, w), \
        "out + res in the given forward() requires full broadcast or exact match"

    out = pallas_residual_relu(res, conv_out)                   # relu(out + res)
    out = out.reshape(n, t, h, w, cout).transpose(0, 4, 1, 2, 3)
    return out


def temporal_conv_net_forward(data, params):
    x = data.astype(jnp.float32)
    for blk in params["blocks"]:
        x = temporal_block_forward(x, blk)
    return x


# ----------------------------- params -----------------------------

def init_params(key, num_inputs, num_channels, kernel_size=4):
    blocks = []
    in_c = num_inputs
    keys = jax.random.split(key, len(num_channels))
    for i, out_c in enumerate(num_channels):
        d = 2 ** i
        tp = (kernel_size - 1) * d
        kw_key, kb_key, dw_key, db_key = jax.random.split(keys[i], 4)
        # conv2 = weight_norm(Conv3d(out_c, out_c, k, stride=(1,2,2),
        #                            dilation=(d,1,1), padding=(tp,1,1)))
        # conv1 is built by the torch module but never called in forward().
        w = 0.05 * jax.random.normal(
            kw_key, (out_c, out_c, kernel_size, kernel_size, kernel_size),
            jnp.float32)
        b = 0.05 * jax.random.normal(kb_key, (out_c,), jnp.float32)

        cpad = _round_up(out_c, 128)
        kk = kernel_size ** 3
        w_mat = jnp.transpose(w, (2, 3, 4, 1, 0)).reshape(kk * out_c, out_c)
        w_mat = jnp.pad(w_mat, ((0, 0), (0, cpad - out_c))).astype(jnp.bfloat16)
        b_pad = jnp.pad(b, (0, cpad - out_c)).reshape(1, cpad).astype(jnp.float32)

        blk = {"w": w, "b": b, "w_mat": w_mat, "b_pad": b_pad,
               "dilation": d, "tp": tp, "k": kernel_size, "cout": out_c}
        if in_c != out_c:
            # downsample = Conv3d(in_c, out_c, 1); kept for parity with the module
            # even though the given forward() cannot run in this configuration.
            w_ds = 0.05 * jax.random.normal(dw_key, (out_c, in_c, 1, 1, 1), jnp.float32)
            b_ds = 0.05 * jax.random.normal(db_key, (out_c,), jnp.float32)
            blk["w_ds"] = w_ds
            blk["b_ds"] = b_ds
            blk["w_ds_mat"] = jnp.pad(w_ds.reshape(out_c, in_c).T,
                                      ((0, 0), (0, cpad - out_c))).astype(jnp.bfloat16)
            blk["b_ds_pad"] = jnp.pad(b_ds, (0, cpad - out_c)).reshape(1, cpad).astype(jnp.float32)
        blocks.append(blk)
        in_c = out_c
    return {"blocks": blocks}


# ----------------------------- pure-JAX reference -----------------------------

def temporal_conv_net_reference(data, params):
    x = data.astype(jnp.float32)
    for blk in params["blocks"]:
        tp, d = blk["tp"], blk["dilation"]
        out = jnp.maximum(x[:, :, : x.shape[2] - tp], 0.0)
        out = lax.conv_general_dilated(
            out, blk["w"], window_strides=(1, 2, 2),
            padding=((tp, tp), (1, 1), (1, 1)),
            rhs_dilation=(d, 1, 1),
            dimension_numbers=("NCDHW", "OIDHW", "NCDHW"),
            precision=lax.Precision.HIGHEST)
        out = out + blk["b"].reshape(1, -1, 1, 1, 1)
        out = jnp.maximum(out[:, :, : out.shape[2] - tp], 0.0)
        if "w_ds" in blk:
            res = lax.conv_general_dilated(
                x, blk["w_ds"], (1, 1, 1), ((0, 0), (0, 0), (0, 0)),
                dimension_numbers=("NCDHW", "OIDHW", "NCDHW"),
                precision=lax.Precision.HIGHEST) + blk["b_ds"].reshape(1, -1, 1, 1, 1)
        else:
            res = x
        x = jnp.maximum(out + res, 0.0)
    return x


# ----------------------------- main -----------------------------

if __name__ == "__main__":
    # Config implied by the given forward(): kernel_size=4 (default), a single
    # level with num_inputs == num_channels[0] (conv2 consumes n_outputs
    # channels because conv1 is never applied), T = (k-1)*dilation + 1 and
    # H = W = 3 so the residual `out + res` broadcasts.
    N, C, T, H = 2, 32, 4, 3

    key = jax.random.PRNGKey(0)
    kx, kp = jax.random.split(key)
    x = jax.random.normal(kx, (N, C, T, H, H), jnp.float32)
    params = init_params(kp, num_inputs=C, num_channels=[C], kernel_size=4)

    # Closure-jit so the static python ints in `params` stay static while all
    # XLA glue around the Pallas calls fuses into one executable.
    fwd = jax.jit(lambda inp: temporal_conv_net_forward(inp, params))

    out = fwd(x)
    out = jax.block_until_ready(out)
    assert out.shape == (N, C, T, H, H), out.shape
    assert bool(jnp.all(jnp.isfinite(out)))

    ref = temporal_conv_net_reference(x, params)
    err = float(jnp.max(jnp.abs(out - ref)))
    scale = float(jnp.max(jnp.abs(ref))) + 1e-6
    # bf16 MXU inputs with f32 accumulation -> loose tolerance vs f32 reference
    assert err <= 0.05 * scale + 0.05, (err, scale)

    print("KERNEL_OK")
</pallas_src>

<mosaic_0001>
module attributes {stable_mosaic.version = 11 : i64} {
  func.func @_mm_bias_act_single_k_kernel(%arg0: i32, %arg1: i32, %arg2: memref<16x2048xbf16, #tpu.memory_space<vmem>>, %arg3: memref<2048x128xbf16, #tpu.memory_space<vmem>>, %arg4: memref<1x128xf32, #tpu.memory_space<vmem>>, %arg5: memref<16x128xf32, #tpu.memory_space<vmem>>) attributes {dimension_semantics = [#tpu.dimension_semantics<parallel>, #tpu.dimension_semantics<parallel>], iteration_bounds = array<i64: 1, 1>, scalar_prefetch = 0 : i64, scratch_operands = 0 : i64, tpu.core_type = #tpu.core_type<tc>, window_params = [{transform_indices = @transform_0, window_bounds = array<i64: 16, 2048>}, {transform_indices = @transform_1, window_bounds = array<i64: 2048, 128>}, {transform_indices = @transform_2, window_bounds = array<i64: 1, 128>}, {transform_indices = @transform_3, window_bounds = array<i64: 16, 128>}]} {
    %c0 = arith.constant 0 : index
    %c0_0 = arith.constant 0 : index
    %0 = vector.load %arg2[%c0, %c0_0] : memref<16x2048xbf16, #tpu.memory_space<vmem>>, vector<16x2048xbf16>
    %c0_1 = arith.constant 0 : index
    %c0_2 = arith.constant 0 : index
    %1 = vector.load %arg3[%c0_1, %c0_2] : memref<2048x128xbf16, #tpu.memory_space<vmem>>, vector<2048x128xbf16>
    %cst = arith.constant dense<0.000000e+00> : vector<16x128xf32>
    %2 = tpu.matmul %0, %1, %cst {dimension_numbers = #tpu.dot_dimension_numbers<[1], [0], [0], [1], [0, 0, 1, 1], [], []>} : vector<16x2048xbf16>, vector<2048x128xbf16>, vector<16x128xf32> -> vector<16x128xf32>
    %c0_3 = arith.constant 0 : index
    %c0_4 = arith.constant 0 : index
    %3 = vector.load %arg4[%c0_3, %c0_4] : memref<1x128xf32, #tpu.memory_space<vmem>>, vector<1x128xf32>
    %4 = vector.broadcast %3 : vector<1x128xf32> to vector<16x128xf32>
    %5 = arith.addf %2, %4 : vector<16x128xf32>
    %cst_5 = arith.constant 0.000000e+00 : f32
    %6 = vector.broadcast %cst_5 : f32 to vector<16x128xf32>
    %7 = arith.maximumf %5, %6 : vector<16x128xf32>
    %c0_6 = arith.constant 0 : index
    %c0_7 = arith.constant 0 : index
    %8 = vector.load %arg5[%c0_6, %c0_7] : memref<16x128xf32, #tpu.memory_space<vmem>>, vector<16x128xf32>
    tpu.vector_store %arg5[%c0_6, %c0_7], %7 {strides = array<i32>} : memref<16x128xf32, #tpu.memory_space<vmem>>, vector<16x128xf32>,
    return
  }
  func.func @transform_0(%arg0: i32, %arg1: i32) -> (i32, i32) {
    %c0_i32 = arith.constant 0 : i32
    %c0_i32_0 = arith.constant 0 : i32
    return %arg0, %c0_i32 : i32, i32
  }
  func.func @transform_1(%arg0: i32, %arg1: i32) -> (i32, i32) {
    %c0_i32 = arith.constant 0 : i32
    %c0_i32_0 = arith.constant 0 : i32
    return %c0_i32, %arg1 : i32, i32
  }
  func.func @transform_2(%arg0: i32, %arg1: i32) -> (i32, i32) {
    %c0_i32 = arith.constant 0 : i32
    %c0_i32_0 = arith.constant 0 : i32
    return %c0_i32, %arg1 : i32, i32
  }
  func.func @transform_3(%arg0: i32, %arg1: i32) -> (i32, i32) {
    %c0_i32 = arith.constant 0 : i32
    return %arg0, %arg1 : i32, i32
  }
}

module attributes {stable_mosaic.version = 11 : i64} {
  func.func @_add_relu_kernel(%arg0: i32, %arg1: memref<1x36x32xf32, #tpu.memory_space<vmem>>, %arg2: memref<1x1x32xf32, #tpu.memory_space<vmem>>, %arg3: memref<1x36x32xf32, #tpu.memory_space<vmem>>) attributes {dimension_semantics = [#tpu.dimension_semantics<parallel>], iteration_bounds = array<i64: 2>, scalar_prefetch = 0 : i64, scratch_operands = 0 : i64, tpu.core_type = #tpu.core_type<tc>, window_params = [{transform_indices = @transform_0, window_bounds = array<i64: 1, 36, 32>}, {transform_indices = @transform_1, window_bounds = array<i64: 1, 1, 32>}, {transform_indices = @transform_2, window_bounds = array<i64: 1, 36, 32>}]} {
    %c0 = arith.constant 0 : index
    %c0_0 = arith.constant 0 : index
    %c0_1 = arith.constant 0 : index
    %0 = vector.load %arg1[%c0, %c0_0, %c0_1] : memref<1x36x32xf32, #tpu.memory_space<vmem>>, vector<1x36x32xf32>
    %c0_2 = arith.constant 0 : index
    %c0_3 = arith.constant 0 : index
    %c0_4 = arith.constant 0 : index
    %1 = vector.load %arg2[%c0_2, %c0_3, %c0_4] : memref<1x1x32xf32, #tpu.memory_space<vmem>>, vector<1x1x32xf32>
    %2 = vector.broadcast %1 : vector<1x1x32xf32> to vector<1x36x32xf32>
    %3 = arith.addf %0, %2 : vector<1x36x32xf32>
    %cst = arith.constant 0.000000e+00 : f32
    %4 = vector.broadcast %cst : f32 to vector<1x36x32xf32>
    %5 = arith.maximumf %3, %4 : vector<1x36x32xf32>
    %c0_5 = arith.constant 0 : index
    %c0_6 = arith.constant 0 : index
    %c0_7 = arith.constant 0 : index
    %6 = vector.load %arg3[%c0_5, %c0_6, %c0_7] : memref<1x36x32xf32, #tpu.memory_space<vmem>>, vector<1x36x32xf32>
    tpu.vector_store %arg3[%c0_5, %c0_6, %c0_7], %5 {strides = array<i32>} : memref<1x36x32xf32, #tpu.memory_space<vmem>>, vector<1x36x32xf32>,
    return
  }
  func.func @transform_0(%arg0: i32) -> (i32, i32, i32) {
    %c0_i32 = arith.constant 0 : i32
    %c0_i32_0 = arith.constant 0 : i32
    %c0_i32_1 = arith.constant 0 : i32
    return %arg0, %c0_i32, %c0_i32_0 : i32, i32, i32
  }
  func.func @transform_1(%arg0: i32) -> (i32, i32, i32) {
    %c0_i32 = arith.constant 0 : i32
    %c0_i32_0 = arith.constant 0 : i32
    %c0_i32_1 = arith.constant 0 : i32
    return %arg0, %c0_i32, %c0_i32_0 : i32, i32, i32
  }
  func.func @transform_2(%arg0: i32) -> (i32, i32, i32) {
    %c0_i32 = arith.constant 0 : i32
    %c0_i32_0 = arith.constant 0 : i32
    %c0_i32_1 = arith.constant 0 : i32
    return %arg0, %c0_i32, %c0_i32_0 : i32, i32, i32
  }
}

</mosaic_0001>

<bundles_post_ra>
// kernel: _lambda_.3
= control target key start
LH: loop header
LB: loop body
LE: loop exit
PB: predicated region body
PF: predicated region fallthrough
CT: control target
= control target key end

     0   :  { %s293_s9 = smov 0   ;;  %s313_s0 = inlined_call_operand.vmem [shape: f32[2,36,32], index: 0, kind: input, shape index: {}]   ;;  %s314_s1 = inlined_call_operand.vmem [shape: f32[2,1,32], index: 1, kind: input, shape index: {}]   ;;  %s315_s2 = inlined_call_operand.vmem [shape: f32[2,36,32], index: 2, kind: output, shape index: {}]  }
   0x1 LB: > { %s251_s10 = sadd.s32 4294967295, %s276_s9   ;;  %p255_p0 = scmp.ge.s32.totalorder %s276_s9, 1  ;;  %s276_s9 = sphi %s293_s9, %s12_s9  }
   0x2   : > { %p120_p1 = scmp.lt.s32.totalorder %s276_s9, 3 }
   0x4   : > { %p121_p2 = pnand %p255_p0, %p120_p1 }
   0x5   : > { %p145_p3 = scmp.lt.s32.totalorder (!%p121_p2), %s251_s10, 1  ;;  %vm180_vm0 = vcmask (!%p121_p2), 261120   ;;  %vm185_vm1 = vcmask (!%p121_p2), 257024  }
   0x6   : > { %124 = sbr.rel (%p121_p2) target bundleno = 25 (0x19), region = 28 }
   0xd   : > { %s317_s10 = smov (!%p145_p3, %s251_s10), 1 }
   0xe   : > { %s261_s11 = smul.u32 40, %s317_s10  ;;  %s152_s14 = scalar_lea.vmem %s314_s1, %s317_s10 }
   0xf   : > { %v258_v0 = vld [vmem:[%s152_s14] ss:$0 sm:$0xff] }
  0x10   : > { %s149_s17 = scalar_lea.vmem %s313_s0, %s261_s11  ;;  %s157_s20 = scalar_lea.vmem %s315_s2, %s261_s11 }
  0x11   : > { %v158_v1 = vld [vmem:[%s149_s17] sm:$0xff]  ;;  %v159_v2 = vld [vmem:[%s149_s17 + $0x8] sm:$0xff]  ;;  %v160_v3 = vld [vmem:[%s149_s17 + $0x10] sm:$0xff] }
  0x12   : > { %v170_v4 = vadd.f32 %v258_v0, %v158_v1  ;;  %v171_v5 = vadd.f32 %v258_v0, %v159_v2  ;;  %v172_v6 = vadd.f32 %v258_v0, %v160_v3  ;;  %v161_v7 = vld [vmem:[%s149_s17 + $0x18] sm:$0xff]  ;;  %v162_v8 = vld [vmem:[%s149_s17 + $0x20] sm:$0xf] }
  0x13   : > { %v173_v9 = vadd.f32 %v258_v0, %v161_v7  ;;  %v174_v10 = vadd.f32 %v258_v0, %v162_v8 }
  0x14   : > { %v175_v11 = vmax.f32 %v170_v4, 0.0  ;;  %v176_v12 = vmax.f32 %v171_v5, 0.0  ;;  %v177_v13 = vmax.f32 %v172_v6, 0.0 }
  0x15   : > { %v178_v14 = vmax.f32 %v173_v9, 0.0  ;;  %v179_v15 = vmax.f32 %v174_v10, 0.0 }
  0x16   : > { %181 = vst.msk [vmem:[%s157_s20] sm:$0xff] %vm180_vm0, %v175_v11  ;;  %182 = vst.msk [vmem:[%s157_s20 + $0x8] sm:$0xff] %vm180_vm0, %v176_v12 }
  0x17   : > { %183 = vst.msk [vmem:[%s157_s20 + $0x10] sm:$0xff] %vm180_vm0, %v177_v13  ;;  %184 = vst.msk [vmem:[%s157_s20 + $0x18] sm:$0xff] %vm180_vm0, %v178_v14 }
  0x18   : > { %186 = vst.msk [vmem:[%s157_s20 + $0x20] sm:$0xf] %vm185_vm1, %v179_v15 }
  0x19 PF: > { %s12_s9 = sadd.s32 1, %s276_s9  }
  0x1a   : > { %p9_p4 = scmp.ge.s32.totalorder %s12_s9, 4  }
  0x1c   :  { %11 = sbr.rel (!%p9_p4) target bundleno = 1 (0x1), region = 61 }

// kernel: _lambda_.2
= control target key start
LH: loop header
LB: loop body
LE: loop exit
PB: predicated region body
PF: predicated region fallthrough
CT: control target
= control target key end

     0   :  { %8 = vsyncpa [#allocation3], 0  ;;  %s1969_s12 = smov [#allocation2]   ;;  %s2061_s0 = inlined_call_operand.vmem [shape: bf16[16,2048], index: 0, kind: input, shape index: {}]   ;;  %s2062_s1 = inlined_call_operand.hbm [shape: bf16[2048,128], index: 1, kind: input, shape index: {}]   ;;  %s2063_s2 = inlined_call_operand.vmem [shape: f32[1,128], index: 2, kind: input, shape index: {}]   ;;  %s2064_s3 = inlined_call_operand.vmem [shape: f32[16,128], index: 3, kind: output, shape index: {}]  }
   0x1   :  { %s16_s13 = sshll.u32 %s1969_s12, 4  ;;  %s1945_s16 = scalar_lea.hbm %s2062_s1, 16384  ;;  %s17_s13 = int_to_ptr.vmem [resolvable:$true] %s16_s13 }
   0x2   :  { %p1946_p0 = scmp.ne.s32.totalorder %s2062_s1, %s1945_s16  ;;  %p1949_p1 = scmp.lt.u32.totalorder %s1945_s16, %s2062_s1 }
   0x4   :  { %p1951_p2 = pnand %p1949_p1, %p1946_p0 }
   0x6   :  { %1954 = shalt.err (!%p1951_p2)
}
   0x7   :  { %s1955_s21 = scalar_lea.vmem %s17_s13, 16384  ;;  %p1960_p4 = scmp.lt.s32.totalorder %s17_s13, %s17_s13 }
   0x8   :  { %p1956_p3 = scmp.ne.s32.totalorder %s17_s13, %s1955_s21  ;;  %p1961_p5 = scmp.lt.s32.totalorder %s1955_s21, %s1955_s21 }
   0xa   :  { %p1962_p6 = por %p1961_p5, %p1960_p4 }
   0xc   :  { %p1963_p7 = pnand %p1962_p6, %p1956_p3 }
   0xe   :  { %1966 = shalt.err (!%p1963_p7)
}
   0xf   :  { %s1970_s22 = smov 64   ;;  %s1971_s23 = smov 4  }
  0x10   :  { %22 = dma.hbm_to_vmem [thread:$0]  %s2062_s1, 16384, %s17_s13, [#allocation3], %s1970_s22, %s1970_s22, %s1971_s23  }
  0x11   :  { %1967 = dma.done.wait [#allocation3], 16384  }
  0x12   :  { %1968 = vsyncadd [#allocation3], 4294950912  ;;  %v1817_v0 = vld [vmem:[#allocation2 + $0x40] sm:$0xff]   ;;  %v1821_v4 = vld [vmem:[#allocation2 + $0x48] sm:$0xff]  }
  0x13   :  { %v1818_v1 = vld [vmem:[#allocation2 + $0xc0] sm:$0xff]   ;;  %1638 = vmatprep.subr.bf16.mxu0 %v1817_v0  ;;  %v1822_v5 = vld [vmem:[#allocation2 + $0xc8] sm:$0xff]   ;;  %v1825_v8 = vld [vmem:[#allocation2 + $0x50] sm:$0xff]  }
  0x14   :  { %v1819_v2 = vld [vmem:[#allocation2] sm:$0xff]   ;;  %1660 = vmatprep.subr.bf16.mxu1 %v1818_v1  ;;  %v1823_v6 = vld [vmem:[#allocation2 + $0x8] sm:$0xff]   ;;  %v1826_v9 = vld [vmem:[#allocation2 + $0xd0] sm:$0xff]  }
  0x15   :  { %v1820_v3 = vld [vmem:[#allocation2 + $0x80] sm:$0xff]   ;;  %1639 = vmatpush3.bf16.msra.mxu0 %v1819_v2  ;;  %v1824_v7 = vld [vmem:[#allocation2 + $0x88] sm:$0xff]   ;;  %v1827_v10 = vld [vmem:[#allocation2 + $0x10] sm:$0xff]  }
  0x16   :  { %1661 = vmatpush3.bf16.msra.mxu1 %v1820_v3  ;;  %1640 = vmatprep.subr.bf16.mxu0 %v1821_v4  ;;  %v1828_v11 = vld [vmem:[#allocation2 + $0x90] sm:$0xff]   ;;  %v1829_v12 = vld [vmem:[#allocation2 + $0x58] sm:$0xff]   ;;  %v1833_v16 = vld [vmem:[#allocation2 + $0x60] sm:$0xff]  }
  0x17   :  { %1662 = vmatprep.subr.bf16.mxu1 %v1822_v5  ;;  %v1830_v13 = vld [vmem:[#allocation2 + $0xd8] sm:$0xff]   ;;  %v1834_v17 = vld [vmem:[#allocation2 + $0xe0] sm:$0xff]   ;;  %v1837_v20 = vld [vmem:[#allocation2 + $0x68] sm:$0xff]  }
  0x18   :  { %v1831_v14 = vld [vmem:[#allocation2 + $0x18] sm:$0xff]   ;;  %v1835_v18 = vld [vmem:[#allocation2 + $0x20] sm:$0xff]   ;;  %v1838_v21 = vld [vmem:[#allocation2 + $0xe8] sm:$0xff]  }
  0x19   :  { %1641 = vmatpush3.bf16.msra.mxu0 %v1823_v6  ;;  %v1832_v15 = vld [vmem:[#allocation2 + $0x98] sm:$0xff]   ;;  %v1836_v19 = vld [vmem:[#allocation2 + $0xa0] sm:$0xff]   ;;  %v1839_v22 = vld [vmem:[#allocation2 + $0x28] sm:$0xff]  }
  0x1a   :  { %1663 = vmatpush3.bf16.msra.mxu1 %v1824_v7  ;;  %1642 = vmatprep.subr.bf16.mxu0 %v1825_v8  ;;  %v1840_v23 = vld [vmem:[#allocation2 + $0xa8] sm:$0xff]   ;;  %v1841_v24 = vld [vmem:[#allocation2 + $0x70] sm:$0xff]   ;;  %v1845_v28 = vld [vmem:[#allocation2 + $0x78] sm:$0xff]  }
  0x1b   :  { %1664 = vmatprep.subr.bf16.mxu1 %v1826_v9  ;;  %v1842_v25 = vld [vmem:[#allocation2 + $0xf0] sm:$0xff]   ;;  %v1846_v29 = vld [vmem:[#allocation2 + $0xf8] sm:$0xff]   ;;  %v29_v32 = vld [vmem:[%s2061_s0] sm:$0xff] }
  0x1c   :  { %v1843_v26 = vld [vmem:[#allocation2 + $0x30] sm:$0xff]   ;;  %v1847_v30 = vld [vmem:[#allocation2 + $0x38] sm:$0xff]   ;;  %v37_v33 = vld [vmem:[%s2061_s0 + $0x40] sm:$0xff] }
  0x1d   :  { %1643 = vmatpush3.bf16.msra.mxu0 %v1827_v10  ;;  %v1844_v27 = vld [vmem:[#allocation2 + $0xb0] sm:$0xff]   ;;  %v1848_v31 = vld [vmem:[#allocation2 + $0xb8] sm:$0xff]   ;;  %v30_v34 = vld [vmem:[%s2061_s0 + $0x8] sm:$0xff]  ;;  %v1494_v35 = vcombine.low %v29_v32, %v37_v33  ;;  %v1495_v36 = vcombine.high %v29_v32, %v37_v33 }
  0x1e   :  { %1665 = vmatpush3.bf16.msra.mxu1 %v1828_v11  ;;  %1644 = vmatprep.subr.bf16.mxu0 %v1829_v12  ;;  %v38_v37 = vld [vmem:[%s2061_s0 + $0x48] sm:$0xff]  ;;  %v1849_v40 = vld [vmem:[#allocation2 + $0x140] sm:$0xff]   ;;  %v1857_v48 = vld [vmem:[#allocation2 + $0x150] sm:$0xff]  }
  0x1f   :  { %1666 = vmatprep.subr.bf16.mxu1 %v1830_v13  ;;  %v1496_v38 = vcombine.low %v30_v34, %v38_v37  ;;  %v1497_v39 = vcombine.high %v30_v34, %v38_v37  ;;  %1188 = vmatprep.mubr.bf16.mxu0 %v1495_v36  ;;  %v1850_v41 = vld [vmem:[#allocation2 + $0x1c0] sm:$0xff]   ;;  %v1853_v44 = vld [vmem:[#allocation2 + $0x148] sm:$0xff]   ;;  %v1858_v49 = vld [vmem:[#allocation2 + $0x1d0] sm:$0xff]  }
  0x20   :  { %v1851_v42 = vld [vmem:[#allocation2 + $0x100] sm:$0xff]   ;;  %v1854_v45 = vld [vmem:[#allocation2 + $0x1c8] sm:$0xff]   ;;  %v1859_v50 = vld [vmem:[#allocation2 + $0x110] sm:$0xff]  }
  0x21   :  { %1645 = vmatpush3.bf16.msra.mxu0 %v1831_v14  ;;  %1229 = vmatprep.mubr.bf16.mxu1 %v1497_v39  ;;  %v1852_v43 = vld [vmem:[#allocation2 + $0x180] sm:$0xff]   ;;  %v1855_v46 = vld [vmem:[#allocation2 + $0x108] sm:$0xff]   ;;  %v1860_v51 = vld [vmem:[#allocation2 + $0x190] sm:$0xff]  }
  0x22   :  { %1667 = vmatpush3.bf16.msra.mxu1 %v1832_v15  ;;  %1646 = vmatprep.subr.bf16.mxu0 %v1833_v16  ;;  %v1856_v47 = vld [vmem:[#allocation2 + $0x188] sm:$0xff]   ;;  %v1861_v52 = vld [vmem:[#allocation2 + $0x158] sm:$0xff]   ;;  %v1865_v56 = vld [vmem:[#allocation2 + $0x160] sm:$0xff]  }
  0x23   :  { %1668 = vmatprep.subr.bf16.mxu1 %v1834_v17  ;;  %v1862_v53 = vld [vmem:[#allocation2 + $0x1d8] sm:$0xff]   ;;  %v1866_v57 = vld [vmem:[#allocation2 + $0x1e0] sm:$0xff]   ;;  %v1869_v60 = vld [vmem:[#allocation2 + $0x168] sm:$0xff]  }
  0x24   :  { %v1863_v54 = vld [vmem:[#allocation2 + $0x118] sm:$0xff]   ;;  %v1867_v58 = vld [vmem:[#allocation2 + $0x120] sm:$0xff]   ;;  %v1870_v61 = vld [vmem:[#allocation2 + $0x1e8] sm:$0xff]  }
  0x25   :  { %1647 = vmatpush3.bf16.msra.mxu0 %v1835_v18  ;;  %v1864_v55 = vld [vmem:[#allocation2 + $0x198] sm:$0xff]   ;;  %v1868_v59 = vld [vmem:[#allocation2 + $0x1a0] sm:$0xff]   ;;  %v1871_v62 = vld [vmem:[#allocation2 + $0x128] sm:$0xff]  }
  0x26   :  { %1669 = vmatpush3.bf16.msra.mxu1 %v1836_v19  ;;  %1648 = vmatprep.subr.bf16.mxu0 %v1837_v20  ;;  %v1872_v63 = vld [vmem:[#allocation2 + $0x1a8] sm:$0xff]   ;;  %v1873_v0 = vld [vmem:[#allocation2 + $0x170] sm:$0xff]   ;;  %v1877_v4 = vld [vmem:[#allocation2 + $0x178] sm:$0xff]  }
  0x27   :  { %1670 = vmatprep.subr.bf16.mxu1 %v1838_v21  ;;  %v1874_v1 = vld [vmem:[#allocation2 + $0x1f0] sm:$0xff]   ;;  %v1878_v5 = vld [vmem:[#allocation2 + $0x1f8] sm:$0xff]   ;;  %v1881_v16 = vld [vmem:[#allocation2 + $0x240] sm:$0xff]  }
  0x28   :  { %v1875_v2 = vld [vmem:[#allocation2 + $0x130] sm:$0xff]   ;;  %v1879_v6 = vld [vmem:[#allocation2 + $0x138] sm:$0xff]   ;;  %v1882_v17 = vld [vmem:[#allocation2 + $0x2c0] sm:$0xff]  }
  0x29   :  { %1649 = vmatpush3.bf16.msra.mxu0 %v1839_v22  ;;  %v1876_v3 = vld [vmem:[#allocation2 + $0x1b0] sm:$0xff]   ;;  %v1880_v7 = vld [vmem:[#allocation2 + $0x1b8] sm:$0xff]   ;;  %v1883_v18 = vld [vmem:[#allocation2 + $0x200] sm:$0xff]  }
  0x2a   :  { %1671 = vmatpush3.bf16.msra.mxu1 %v1840_v23  ;;  %1650 = vmatprep.subr.bf16.mxu0 %v1841_v24  ;;  %v31_v8 = vld [vmem:[%s2061_s0 + $0x10] sm:$0xff]  ;;  %v32_v12 = vld [vmem:[%s2061_s0 + $0x18] sm:$0xff]  ;;  %v1884_v19 = vld [vmem:[#allocation2 + $0x280] sm:$0xff]  }
  0x2b   :  { %1672 = vmatprep.subr.bf16.mxu1 %v1842_v25  ;;  %v39_v9 = vld [vmem:[%s2061_s0 + $0x50] sm:$0xff]  ;;  %v40_v13 = vld [vmem:[%s2061_s0 + $0x58] sm:$0xff]  ;;  %v1885_v20 = vld [vmem:[#allocation2 + $0x248] sm:$0xff]  }
  0x2c   :  { %v1498_v10 = vcombine.low %v31_v8, %v39_v9  ;;  %v1499_v11 = vcombine.high %v31_v8, %v39_v9  ;;  %v1500_v14 = vcombine.low %v32_v12, %v40_v13  ;;  %v1501_v15 = vcombine.high %v32_v12, %v40_v13  ;;  %v1886_v21 = vld [vmem:[#allocation2 + $0x2c8] sm:$0xff]   ;;  %v1889_v24 = vld [vmem:[#allocation2 + $0x250] sm:$0xff]   ;;  %v1897_v32 = vld [vmem:[#allocation2 + $0x260] sm:$0xff]  }
  0x2d   :  { %1651 = vmatpush3.bf16.msra.mxu0 %v1843_v26  ;;  %v1887_v22 = vld [vmem:[#allocation2 + $0x208] sm:$0xff]   ;;  %v1890_v25 = vld [vmem:[#allocation2 + $0x2d0] sm:$0xff]   ;;  %v1898_v33 = vld [vmem:[#allocation2 + $0x2e0] sm:$0xff]  }
  0x2e   :  { %1673 = vmatpush3.bf16.msra.mxu1 %v1844_v27  ;;  %1652 = vmatprep.subr.bf16.mxu0 %v1845_v28  ;;  %v1888_v23 = vld [vmem:[#allocation2 + $0x288] sm:$0xff]   ;;  %v1891_v26 = vld [vmem:[#allocation2 + $0x210] sm:$0xff]   ;;  %v1893_v28 = vld [vmem:[#allocation2 + $0x258] sm:$0xff]  }
  0x2f   :  { %1674 = vmatprep.subr.bf16.mxu1 %v1846_v29  ;;  %v1892_v27 = vld [vmem:[#allocation2 + $0x290] sm:$0xff]   ;;  %v1894_v29 = vld [vmem:[#allocation2 + $0x2d8] sm:$0xff]   ;;  %v1899_v34 = vld [vmem:[#allocation2 + $0x220] sm:$0xff]  }
  0x30   :  { %v1901_v36 = vld [vmem:[#allocation2 + $0x268] sm:$0xff]   ;;  %v1929_v8 = vld [vmem:[#allocation2 + $0x360] sm:$0xff]  }
  0x31   :  { %1653 = vmatpush3.bf16.msra.mxu0 %v1847_v30  ;;  %v1895_v30 = vld [vmem:[#allocation2 + $0x218] sm:$0xff]   ;;  %v1902_v37 = vld [vmem:[#allocation2 + $0x2e8] sm:$0xff]   ;;  %v1930_v9 = vld [vmem:[#allocation2 + $0x3e0] sm:$0xff]  }
  0x32   :  { %1675 = vmatpush3.bf16.msra.mxu1 %v1848_v31  ;;  %1682 = vmatprep.subr.bf16.mxu0 %v1849_v40  ;;  %v1896_v31 = vld [vmem:[#allocation2 + $0x298] sm:$0xff]   ;;  %v1904_v39 = vld [vmem:[#allocation2 + $0x2a8] sm:$0xff]   ;;  %v1905_v40 = vld [vmem:[#allocation2 + $0x270] sm:$0xff]  }
  0x33   :  { %1704 = vmatprep.subr.bf16.mxu1 %v1850_v41  ;;  %v1906_v41 = vld [vmem:[#allocation2 + $0x2f0] sm:$0xff]   ;;  %v1933_v12 = vld [vmem:[#allocation2 + $0x368] sm:$0xff]  }
  0x34   :  { %1189 = vmatmul.mubr.bf16.vlgmr.msra.gmra.mrb[0].mxu0 %v1494_v35  ;;  %v1900_v35 = vld [vmem:[#allocation2 + $0x2a0] sm:$0xff]   ;;  %v1934_v13 = vld [vmem:[#allocation2 + $0x3e8] sm:$0xff]  }
  0x35   :  { %1230 = vmatmul.mubr.bf16.vlgmr.msra.gmra.mrb[0].mxu1 %v1496_v38  ;;  %1683 = vmatpush3.bf16.msra.mxu0 %v1851_v42  ;;  %v1903_v38 = vld [vmem:[#allocation2 + $0x228] sm:$0xff]   ;;  %v1907_v42 = vld [vmem:[#allocation2 + $0x230] sm:$0xff]  }
  0x36   :  { %1705 = vmatpush3.bf16.msra.mxu1 %v1852_v43  ;;  %1684 = vmatprep.subr.bf16.mxu0 %v1853_v44  ;;  %v1908_v43 = vld [vmem:[#allocation2 + $0x2b0] sm:$0xff]   ;;  %v1909_v44 = vld [vmem:[#allocation2 + $0x278] sm:$0xff]  }
  0x37   :  { %1706 = vmatprep.subr.bf16.mxu1 %v1854_v45  ;;  %1270 = vmatprep.mubr.bf16.mxu0 %v1499_v11  ;;  %v1910_v45 = vld [vmem:[#allocation2 + $0x2f8] sm:$0xff]   ;;  %v1932_v11 = vld [vmem:[#allocation2 + $0x3a0] sm:$0xff]  }
  0x38   :  { %1311 = vmatprep.mubr.bf16.mxu1 %v1501_v15  ;;  %v1936_v15 = vld [vmem:[#allocation2 + $0x3a8] sm:$0xff]  }
  0x39   :  { %1685 = vmatpush3.bf16.msra.mxu0 %v1855_v46  ;;  %v1911_v46 = vld [vmem:[#allocation2 + $0x238] sm:$0xff]  }
  0x3a   :  { %1707 = vmatpush3.bf16.msra.mxu1 %v1856_v47  ;;  %1686 = vmatprep.subr.bf16.mxu0 %v1857_v48  ;;  %v1912_v47 = vld [vmem:[#allocation2 + $0x2b8] sm:$0xff]   ;;  %v33_v48 = vld [vmem:[%s2061_s0 + $0x20] sm:$0xff] }
  0x3b   :  { %1708 = vmatprep.subr.bf16.mxu1 %v1858_v49  ;;  %v41_v49 = vld [vmem:[%s2061_s0 + $0x60] sm:$0xff] }
  0x3d   :  { %1687 = vmatpush3.bf16.msra.mxu0 %v1859_v50  ;;  %v34_v50 = vld [vmem:[%s2061_s0 + $0x28] sm:$0xff] }
  0x3e   :  { %1709 = vmatpush3.bf16.msra.mxu1 %v1860_v51  ;;  %1688 = vmatprep.subr.bf16.mxu0 %v1861_v52  ;;  %v42_v51 = vld [vmem:[%s2061_s0 + $0x68] sm:$0xff]  ;;  %v1502_v52 = vcombine.low %v33_v48, %v41_v49 }
  0x3f   :  { %1710 = vmatprep.subr.bf16.mxu1 %v1862_v53  ;;  %v1503_v53 = vcombine.high %v33_v48, %v41_v49 }
  0x41   :  { %1689 = vmatpush3.bf16.msra.mxu0 %v1863_v54  ;;  %v1504_v54 = vcombine.low %v34_v50, %v42_v51 }
  0x42   :  { %1711 = vmatpush3.bf16.msra.mxu1 %v1864_v55  ;;  %1690 = vmatprep.subr.bf16.mxu0 %v1865_v56  ;;  %v1505_v55 = vcombine.high %v34_v50, %v42_v51  ;;  %v1913_v56 = vld [vmem:[#allocation2 + $0x340] sm:$0xff]  }
  0x43   :  { %1712 = vmatprep.subr.bf16.mxu1 %v1866_v57  ;;  %v1914_v57 = vld [vmem:[#allocation2 + $0x3c0] sm:$0xff]  }
  0x45   :  { %1691 = vmatpush3.bf16.msra.mxu0 %v1867_v58  ;;  %v1915_v58 = vld [vmem:[#allocation2 + $0x300] sm:$0xff]  }
  0x46   :  { %1713 = vmatpush3.bf16.msra.mxu1 %v1868_v59  ;;  %1692 = vmatprep.subr.bf16.mxu0 %v1869_v60  ;;  %v1916_v59 = vld [vmem:[#allocation2 + $0x380] sm:$0xff]   ;;  %v1917_v60 = vld [vmem:[#allocation2 + $0x348] sm:$0xff]  }
  0x47   :  { %1714 = vmatprep.subr.bf16.mxu1 %v1870_v61  ;;  %v1918_v61 = vld [vmem:[#allocation2 + $0x3c8] sm:$0xff]  }
  0x49   :  { %1693 = vmatpush3.bf16.msra.mxu0 %v1871_v62  ;;  %v1919_v62 = vld [vmem:[#allocation2 + $0x308] sm:$0xff]  }
  0x4a   :  { %1715 = vmatpush3.bf16.msra.mxu1 %v1872_v63  ;;  %1694 = vmatprep.subr.bf16.mxu0 %v1873_v0  ;;  %v1920_v63 = vld [vmem:[#allocation2 + $0x388] sm:$0xff]   ;;  %v1921_v0 = vld [vmem:[#allocation2 + $0x350] sm:$0xff]  }
  0x4b   :  { %1716 = vmatprep.subr.bf16.mxu1 %v1874_v1  ;;  %v1922_v1 = vld [vmem:[#allocation2 + $0x3d0] sm:$0xff]  }
  0x4d   :  { %1695 = vmatpush3.bf16.msra.mxu0 %v1875_v2  ;;  %v1923_v2 = vld [vmem:[#allocation2 + $0x310] sm:$0xff]  }
  0x4e   :  { %1717 = vmatpush3.bf16.msra.mxu1 %v1876_v3  ;;  %1696 = vmatprep.subr.bf16.mxu0 %v1877_v4  ;;  %v1924_v3 = vld [vmem:[#allocation2 + $0x390] sm:$0xff]   ;;  %v1925_v4 = vld [vmem:[#allocation2 + $0x358] sm:$0xff]  }
  0x4f   :  { %1718 = vmatprep.subr.bf16.mxu1 %v1878_v5  ;;  %v1926_v5 = vld [vmem:[#allocation2 + $0x3d8] sm:$0xff]  }
  0x51   :  { %1697 = vmatpush3.bf16.msra.mxu0 %v1879_v6  ;;  %v1927_v6 = vld [vmem:[#allocation2 + $0x318] sm:$0xff]  }
  0x52   :  { %1719 = vmatpush3.bf16.msra.mxu1 %v1880_v7  ;;  %1726 = vmatprep.subr.bf16.mxu0 %v1881_v16  ;;  %v1928_v7 = vld [vmem:[#allocation2 + $0x398] sm:$0xff]   ;;  %v1937_v16 = vld [vmem:[#allocation2 + $0x370] sm:$0xff]  }
  0x53   :  { %1748 = vmatprep.subr.bf16.mxu1 %v1882_v17  ;;  %v1938_v17 = vld [vmem:[#allocation2 + $0x3f0] sm:$0xff]  }
  0x54   :  { %1271 = vmatmul.mubr.bf16.vlgmr.msra.gmra.mrb[4].mxu0 %v1498_v10  ;;  %v1931_v10 = vld [vmem:[#allocation2 + $0x320] sm:$0xff]  }
  0x55   :  { %1312 = vmatmul.mubr.bf16.vlgmr.msra.gmra.mrb[4].mxu1 %v1500_v14  ;;  %1727 = vmatpush3.bf16.msra.mxu0 %v1883_v18  ;;  %v1935_v14 = vld [vmem:[#allocation2 + $0x328] sm:$0xff]   ;;  %v1939_v18 = vld [vmem:[#allocation2 + $0x330] sm:$0xff]  }
  0x56   :  { %1749 = vmatpush3.bf16.msra.mxu1 %v1884_v19  ;;  %1728 = vmatprep.subr.bf16.mxu0 %v1885_v20  ;;  %v1940_v19 = vld [vmem:[#allocation2 + $0x3b0] sm:$0xff]   ;;  %v1941_v20 = vld [vmem:[#allocation2 + $0x378] sm:$0xff]  }
  0x57   :  { %1750 = vmatprep.subr.bf16.mxu1 %v1886_v21  ;;  %1352 = vmatprep.mubr.bf16.mxu0 %v1503_v53  ;;  %v1942_v21 = vld [vmem:[#allocation2 + $0x3f8] sm:$0xff]  }
  0x58   :  { %1393 = vmatprep.mubr.bf16.mxu1 %v1505_v55 }
  0x59   :  { %1729 = vmatpush3.bf16.msra.mxu0 %v1887_v22  ;;  %v1943_v22 = vld [vmem:[#allocation2 + $0x338] sm:$0xff]  }
  0x5a   :  { %1751 = vmatpush3.bf16.msra.mxu1 %v1888_v23  ;;  %1730 = vmatprep.subr.bf16.mxu0 %v1889_v24  ;;  %v1944_v23 = vld [vmem:[#allocation2 + $0x3b8] sm:$0xff]   ;;  %v35_v24 = vld [vmem:[%s2061_s0 + $0x30] sm:$0xff] }
  0x5b   :  { %1752 = vmatprep.subr.bf16.mxu1 %v1890_v25  ;;  %v43_v25 = vld [vmem:[%s2061_s0 + $0x70] sm:$0xff] }
  0x5d   :  { %1731 = vmatpush3.bf16.msra.mxu0 %v1891_v26  ;;  %v36_v26 = vld [vmem:[%s2061_s0 + $0x38] sm:$0xff] }
  0x5e   :  { %1753 = vmatpush3.bf16.msra.mxu1 %v1892_v27  ;;  %1732 = vmatprep.subr.bf16.mxu0 %v1893_v28  ;;  %v1506_v27 = vcombine.low %v35_v24, %v43_v25  ;;  %v1507_v28 = vcombine.high %v35_v24, %v43_v25 }
  0x5f   :  { %1754 = vmatprep.subr.bf16.mxu1 %v1894_v29  ;;  %v44_v29 = vld [vmem:[%s2061_s0 + $0x78] sm:$0xff] }
  0x61   :  { %1733 = vmatpush3.bf16.msra.mxu0 %v1895_v30  ;;  %v1508_v30 = vcombine.low %v36_v26, %v44_v29 }
  0x62   :  { %1755 = vmatpush3.bf16.msra.mxu1 %v1896_v31  ;;  %1734 = vmatprep.subr.bf16.mxu0 %v1897_v32  ;;  %v1509_v31 = vcombine.high %v36_v26, %v44_v29 }
  0x63   :  { %1756 = vmatprep.subr.bf16.mxu1 %v1898_v33 }
  0x65   :  { %1735 = vmatpush3.bf16.msra.mxu0 %v1899_v34  ;;  %v1493_v34 = vld [vmem:[%s2063_s2] ss:$0 sm:$0xff] }
  0x66   :  { %1757 = vmatpush3.bf16.msra.mxu1 %v1900_v35  ;;  %1736 = vmatprep.subr.bf16.mxu0 %v1901_v36 }
  0x67   :  { %1758 = vmatprep.subr.bf16.mxu1 %v1902_v37 }
  0x69   :  { %1737 = vmatpush3.bf16.msra.mxu0 %v1903_v38 }
  0x6a   :  { %1759 = vmatpush3.bf16.msra.mxu1 %v1904_v39  ;;  %1738 = vmatprep.subr.bf16.mxu0 %v1905_v40 }
  0x6b   :  { %1760 = vmatprep.subr.bf16.mxu1 %v1906_v41 }
  0x6d   :  { %1739 = vmatpush3.bf16.msra.mxu0 %v1907_v42 }
  0x6e   :  { %1761 = vmatpush3.bf16.msra.mxu1 %v1908_v43  ;;  %1740 = vmatprep.subr.bf16.mxu0 %v1909_v44 }
  0x6f   :  { %1762 = vmatprep.subr.bf16.mxu1 %v1910_v45 }
  0x71   :  { %1741 = vmatpush3.bf16.msra.mxu0 %v1911_v46 }
  0x72   :  { %1763 = vmatpush3.bf16.msra.mxu1 %v1912_v47  ;;  %1770 = vmatprep.subr.bf16.mxu0 %v1913_v56 }
  0x73   :  { %1792 = vmatprep.subr.bf16.mxu1 %v1914_v57 }
  0x74   :  { %1353 = vmatmul.mubr.bf16.vlgmr.msra.gmra.mrb[8].mxu0 %v1502_v52 }
  0x75   :  { %1394 = vmatmul.mubr.bf16.vlgmr.msra.gmra.mrb[8].mxu1 %v1504_v54  ;;  %1771 = vmatpush3.bf16.msra.mxu0 %v1915_v58 }
  0x76   :  { %1793 = vmatpush3.bf16.msra.mxu1 %v1916_v59  ;;  %1772 = vmatprep.subr.bf16.mxu0 %v1917_v60 }
  0x77   :  { %1794 = vmatprep.subr.bf16.mxu1 %v1918_v61  ;;  %1434 = vmatprep.mubr.bf16.mxu0 %v1507_v28 }
  0x78   :  { %1475 = vmatprep.mubr.bf16.mxu1 %v1509_v31 }
  0x79   :  { %1773 = vmatpush3.bf16.msra.mxu0 %v1919_v62 }
  0x7a   :  { %1795 = vmatpush3.bf16.msra.mxu1 %v1920_v63  ;;  %1774 = vmatprep.subr.bf16.mxu0 %v1921_v0 }
  0x7b   :  { %1796 = vmatprep.subr.bf16.mxu1 %v1922_v1 }
  0x7d   :  { %1775 = vmatpush3.bf16.msra.mxu0 %v1923_v2 }
  0x7e   :  { %1797 = vmatpush3.bf16.msra.mxu1 %v1924_v3  ;;  %1776 = vmatprep.subr.bf16.mxu0 %v1925_v4 }
  0x7f   :  { %1798 = vmatprep.subr.bf16.mxu1 %v1926_v5 }
  0x81   :  { %1777 = vmatpush3.bf16.msra.mxu0 %v1927_v6 }
  0x82   :  { %1799 = vmatpush3.bf16.msra.mxu1 %v1928_v7  ;;  %1778 = vmatprep.subr.bf16.mxu0 %v1929_v8 }
  0x83   :  { %1800 = vmatprep.subr.bf16.mxu1 %v1930_v9 }
  0x85   :  { %1779 = vmatpush3.bf16.msra.mxu0 %v1931_v10 }
  0x86   :  { %1801 = vmatpush3.bf16.msra.mxu1 %v1932_v11  ;;  %1780 = vmatprep.subr.bf16.mxu0 %v1933_v12 }
  0x87   :  { %1802 = vmatprep.subr.bf16.mxu1 %v1934_v13 }
  0x89   :  { %1781 = vmatpush3.bf16.msra.mxu0 %v1935_v14 }
  0x8a   :  { %1803 = vmatpush3.bf16.msra.mxu1 %v1936_v15  ;;  %1782 = vmatprep.subr.bf16.mxu0 %v1937_v16 }
  0x8b   :  { %1804 = vmatprep.subr.bf16.mxu1 %v1938_v17 }
  0x8d   :  { %1783 = vmatpush3.bf16.msra.mxu0 %v1939_v18 }
  0x8e   :  { %1805 = vmatpush3.bf16.msra.mxu1 %v1940_v19  ;;  %1784 = vmatprep.subr.bf16.mxu0 %v1941_v20 }
  0x8f   :  { %1806 = vmatprep.subr.bf16.mxu1 %v1942_v21 }
  0x91   :  { %1785 = vmatpush3.bf16.msra.mxu0 %v1943_v22 }
  0x92   :  { %1807 = vmatpush3.bf16.msra.mxu1 %v1944_v23 }
  0x94   :  { %1435 = vmatmul.mubr.bf16.vlgmr.msra.gmra.mrb[12].mxu0 %v1506_v27 }
  0x95   :  { %1476 = vmatmul.mubr.bf16.vlgmr.msra.gmra.mrb[12].mxu1 %v1508_v30 }
 0x107   :  { %v1654_v32 = vpop.f32.mrb[0].mxu0 }
 0x108   :  { %v1676_v33 = vpop.f32.mrb[0].mxu1  ;;  %v1655_v35 = vpop.f32.mrb[1].mxu0 }
 0x109   :  { %v1656_v36 = vadd.f32 %v1655_v35, %v1654_v32  ;;  %v1677_v37 = vpop.f32.mrb[1].mxu1  ;;  %v1657_v38 = vpop.f32.mrb[2].mxu0 }
 0x10a   :  { %v1678_v39 = vadd.f32 %v1677_v37, %v1676_v33  ;;  %v1679_v40 = vpop.f32.mrb[2].mxu1  ;;  %v1658_v41 = vpop.f32.mrb[3].mxu0 }
 0x10b   :  { %v1191_v42 = vadd.f32 %v1656_v36, %v1493_v34  ;;  %v1659_v43 = vadd.f32 %v1658_v41, %v1657_v38  ;;  %v1680_v44 = vpop.f32.mrb[3].mxu1 }
 0x10c   :  { %v1681_v45 = vadd.f32 %v1680_v44, %v1679_v40 }
 0x10d   :  { %v1232_v46 = vadd.f32 %v1678_v39, %v1191_v42  ;;  %v1194_v47 = vadd.f32 %v1659_v43, %v1493_v34 }
 0x10f   :  { %v1235_v48 = vadd.f32 %v1681_v45, %v1194_v47 }
 0x127   :  { %v1698_v49 = vpop.f32.mrb[4].mxu0 }
 0x128   :  { %v1720_v50 = vpop.f32.mrb[4].mxu1  ;;  %v1699_v51 = vpop.f32.mrb[5].mxu0 }
 0x129   :  { %v1700_v52 = vadd.f32 %v1699_v51, %v1698_v49  ;;  %v1721_v53 = vpop.f32.mrb[5].mxu1  ;;  %v1701_v54 = vpop.f32.mrb[6].mxu0 }
 0x12a   :  { %v1722_v55 = vadd.f32 %v1721_v53, %v1720_v50  ;;  %v1723_v56 = vpop.f32.mrb[6].mxu1  ;;  %v1702_v57 = vpop.f32.mrb[7].mxu0 }
 0x12b   :  { %v1273_v58 = vadd.f32 %v1700_v52, %v1232_v46  ;;  %v1703_v59 = vadd.f32 %v1702_v57, %v1701_v54  ;;  %v1724_v60 = vpop.f32.mrb[7].mxu1 }
 0x12c   :  { %v1725_v61 = vadd.f32 %v1724_v60, %v1723_v56 }
 0x12d   :  { %v1314_v62 = vadd.f32 %v1722_v55, %v1273_v58  ;;  %v1276_v63 = vadd.f32 %v1703_v59, %v1235_v48 }
 0x12f   :  { %v1317_v0 = vadd.f32 %v1725_v61, %v1276_v63 }
 0x147   :  { %v1742_v1 = vpop.f32.mrb[8].mxu0 }
 0x148   :  { %v1764_v2 = vpop.f32.mrb[8].mxu1  ;;  %v1743_v3 = vpop.f32.mrb[9].mxu0 }
 0x149   :  { %v1765_v4 = vpop.f32.mrb[9].mxu1  ;;  %v1744_v5 = vadd.f32 %v1743_v3, %v1742_v1  ;;  %v1745_v7 = vpop.f32.mrb[10].mxu0 }
 0x14a   :  { %v1766_v6 = vadd.f32 %v1765_v4, %v1764_v2  ;;  %v1767_v8 = vpop.f32.mrb[10].mxu1  ;;  %v1746_v9 = vpop.f32.mrb[11].mxu0 }
 0x14b   :  { %v1768_v10 = vpop.f32.mrb[11].mxu1  ;;  %v1355_v11 = vadd.f32 %v1744_v5, %v1314_v62  ;;  %v1747_v12 = vadd.f32 %v1746_v9, %v1745_v7 }
 0x14c   :  { %v1769_v13 = vadd.f32 %v1768_v10, %v1767_v8 }
 0x14d   :  { %v1396_v14 = vadd.f32 %v1766_v6, %v1355_v11  ;;  %v1358_v15 = vadd.f32 %v1747_v12, %v1317_v0 }
 0x14f   :  { %v1399_v16 = vadd.f32 %v1769_v13, %v1358_v15 }
 0x167   :  { %v1786_v17 = vpop.f32.mrb[12].mxu0 }
 0x168   :  { %v1808_v18 = vpop.f32.mrb[12].mxu1  ;;  %v1787_v19 = vpop.f32.mrb[13].mxu0 }
 0x169   :  { %v1788_v20 = vadd.f32 %v1787_v19, %v1786_v17  ;;  %v1809_v21 = vpop.f32.mrb[13].mxu1  ;;  %v1789_v22 = vpop.f32.mrb[14].mxu0 }
 0x16a   :  { %v1810_v23 = vadd.f32 %v1809_v21, %v1808_v18  ;;  %v1811_v24 = vpop.f32.mrb[14].mxu1  ;;  %v1790_v25 = vpop.f32.mrb[15].mxu0 }
 0x16b   :  { %v1437_v26 = vadd.f32 %v1788_v20, %v1396_v14  ;;  %v1791_v27 = vadd.f32 %v1790_v25, %v1789_v22  ;;  %v1812_v28 = vpop.f32.mrb[15].mxu1 }
 0x16c   :  { %v1813_v29 = vadd.f32 %v1812_v28, %v1811_v24 }
 0x16d   :  { %v1478_v30 = vadd.f32 %v1810_v23, %v1437_v26  ;;  %v1440_v31 = vadd.f32 %v1791_v27, %v1399_v16 }
 0x16f   :  { %v1484_v32 = vmax.f32 %v1478_v30, 0.0  ;;  %v1481_v33 = vadd.f32 %v1813_v29, %v1440_v31 }
 0x171   :  { %1486 = vst [vmem:[%s2064_s3] sm:$0xff] %v1484_v32  ;;  %v1485_v34 = vmax.f32 %v1481_v33, 0.0 }
 0x173   :  { %1487 = vst [vmem:[%s2064_s3 + $0x8] sm:$0xff] %v1485_v34 }
 0x174   :  { %1492 = vsyncpa [#allocation3], 1 }

</bundles_post_ra>
